<compile_context>
chip_gen: v6e
topology: v6e:2x2x1
jax: 0.10.0
libtpu: 0.0.40
codegen_flags: <defaults>
</compile_context>

<pallas_src>
import jax
import jax.numpy as jnp
from jax.experimental import pallas as pl
from jax.experimental.pallas import tpu as pltpu


# ----------------------------------------------------------------------------
# Kernel: one (TILE_ROWS, LANES) tile per grid step:  o = x + y * alpha
# ----------------------------------------------------------------------------
def _rezero_kernel(x_ref, y_ref, alpha_ref, o_ref):
    a = alpha_ref[0].astype(jnp.float32)               # scalar from SMEM
    x = x_ref[...].astype(jnp.float32)
    y = y_ref[...].astype(jnp.float32)
    o_ref[...] = (x + y * a).astype(o_ref.dtype)


# ----------------------------------------------------------------------------
# Tiling helpers (all static: shapes are known at trace time)
# ----------------------------------------------------------------------------
def _pick_lane_dim(total, last_dim):
    # Lane-dense last dim: largest power-of-two multiple of 128 dividing the
    # element count.  Fall back to the original trailing dim (full-dim blocks
    # are always layout-legal).
    for lanes in (2048, 1024, 512, 256, 128):
        if total % lanes == 0:
            return lanes
    return last_dim


def _pick_tile_rows(n_rows, lanes, itemsize):
    # ~2 MiB per input tile => 3 streams x double buffer ~ 12 MiB of VMEM max.
    if n_rows <= 8:
        return n_rows                                   # full (tiny) row extent
    target_bytes = 2 << 20
    t = min(n_rows, max(8, target_bytes // (lanes * itemsize)))
    t = max(8, (t // 8) * 8)                            # keep sublane-aligned
    return t


def rezero_pallas(x, y, alpha):
    orig_shape = x.shape
    total = x.size
    itemsize = jnp.dtype(x.dtype).itemsize

    lanes = _pick_lane_dim(total, orig_shape[-1])
    rows = total // lanes
    x2 = x.reshape(rows, lanes)
    y2 = y.reshape(rows, lanes)

    tile_rows = _pick_tile_rows(rows, lanes, itemsize)
    grid = (pl.cdiv(rows, tile_rows),)
    row_spec = pl.BlockSpec((tile_rows, lanes), lambda i: (i, 0))

    out2 = pl.pallas_call(
        _rezero_kernel,
        out_shape=jax.ShapeDtypeStruct((rows, lanes), x.dtype),
        grid=grid,
        in_specs=[
            row_spec,                                            # x tile
            row_spec,                                            # y tile
            pl.BlockSpec(memory_space=pltpu.MemorySpace.SMEM),   # alpha (1,)
        ],
        out_specs=row_spec,
        input_output_aliases={0: 0},        # reuse x's buffer when it is dead
        compiler_params=pltpu.CompilerParams(
            dimension_semantics=("parallel",)),
    )(x2, y2, alpha)
    return out2.reshape(orig_shape)


# ----------------------------------------------------------------------------
# Module wrapper (matches the PyTorch ReZero forward semantics)
# ----------------------------------------------------------------------------
@jax.jit
def _rezero_forward(x, y, weights):
    return rezero_pallas(x, y, weights)


class ReZeroPallas:
    """JAX/Pallas port of the PyTorch ReZero module: forward(x, y) = x + y * w."""

    def __init__(self, hidden_size, simple: bool = True, fill: float = 0.0):
        # Both branches of the PyTorch __init__ create the same scalar weight.
        del hidden_size, simple
        self.weights = jnp.full((1,), fill, dtype=jnp.float32)

    def __call__(self, x, y):
        return _rezero_forward(x, y, self.weights)


# ----------------------------------------------------------------------------
# Self-test
# ----------------------------------------------------------------------------
if __name__ == "__main__":
    key = jax.random.PRNGKey(0)
    k1, k2, k3, k4, k5, k6 = jax.random.split(key, 6)

    # Small transformer-ish shape: batch=2, seq=8, hidden=32.
    B, S, H = 2, 8, 32
    x = jax.random.normal(k1, (B, S, H), dtype=jnp.float32)
    y = jax.random.normal(k2, (B, S, H), dtype=jnp.float32)

    # Default init (fill=0.0): out == x.
    mod0 = ReZeroPallas(H)
    out0 = jax.block_until_ready(mod0(x, y))
    ref0 = x + y * mod0.weights[0]
    assert out0.shape == (B, S, H)
    assert jnp.allclose(out0, ref0, atol=1e-6, rtol=1e-6)

    # Non-zero residual weight exercises the multiply path.
    mod1 = ReZeroPallas(H, fill=0.37)
    out1 = jax.block_until_ready(mod1(x, y))
    ref1 = x + y * mod1.weights[0]
    assert jnp.allclose(out1, ref1, atol=1e-6, rtol=1e-6)

    # Larger, lane-dense shape (total divisible by 2048) with bf16 I/O:
    # exercises the row-tiled grid and the narrow-dtype path.
    B2, S2, H2 = 8, 128, 256
    xb = jax.random.normal(k3, (B2, S2, H2), dtype=jnp.bfloat16)
    yb = jax.random.normal(k4, (B2, S2, H2), dtype=jnp.bfloat16)
    mod2 = ReZeroPallas(H2, fill=0.5)
    out2 = jax.block_until_ready(mod2(xb, yb))
    ref2 = (xb.astype(jnp.float32) + yb.astype(jnp.float32) * 0.5).astype(jnp.bfloat16)
    assert jnp.allclose(out2.astype(jnp.float32), ref2.astype(jnp.float32),
                        atol=1e-2, rtol=1e-2)

    # Ragged shape (hidden not a multiple of 128, rows not a multiple of the
    # tile): exercises the full-dim lane fallback and a partial last block.
    B3, S3, H3 = 3, 5, 96
    xr = jax.random.normal(k5, (B3, S3, H3), dtype=jnp.float32)
    yr = jax.random.normal(k6, (B3, S3, H3), dtype=jnp.float32)
    mod3 = ReZeroPallas(H3, fill=-1.25)
    out3 = jax.block_until_ready(mod3(xr, yr))
    ref3 = xr + yr * mod3.weights[0]
    assert jnp.allclose(out3, ref3, atol=1e-6, rtol=1e-6)

    print("KERNEL_OK")
</pallas_src>

<mosaic_0001>
module attributes {stable_mosaic.version = 11 : i64} {
  func.func @_rezero_kernel(%arg0: i32, %arg1: memref<1x512xf32, #tpu.memory_space<vmem>>, %arg2: memref<1x512xf32, #tpu.memory_space<vmem>>, %arg3: memref<1xf32, #tpu.memory_space<smem>>, %arg4: memref<1x512xf32, #tpu.memory_space<vmem>>) attributes {dimension_semantics = [#tpu.dimension_semantics<parallel>], iteration_bounds = array<i64: 1>, scalar_prefetch = 0 : i64, scratch_operands = 0 : i64, tpu.core_type = #tpu.core_type<tc>, window_params = [{transform_indices = @transform_0, window_bounds = array<i64: 1, 512>}, {transform_indices = @transform_1, window_bounds = array<i64: 1, 512>}, {transform_indices = @transform_2, window_bounds = array<i64: 1>}, {transform_indices = @transform_3, window_bounds = array<i64: 1, 512>}]} {
    %c0 = arith.constant 0 : index
    %0 = memref.load %arg3[%c0] : memref<1xf32, #tpu.memory_space<smem>>
    %c0_0 = arith.constant 0 : index
    %c0_1 = arith.constant 0 : index
    %1 = vector.load %arg1[%c0_0, %c0_1] : memref<1x512xf32, #tpu.memory_space<vmem>>, vector<1x512xf32>
    %c0_2 = arith.constant 0 : index
    %c0_3 = arith.constant 0 : index
    %2 = vector.load %arg2[%c0_2, %c0_3] : memref<1x512xf32, #tpu.memory_space<vmem>>, vector<1x512xf32>
    %3 = vector.broadcast %0 : f32 to vector<1x512xf32>
    %4 = arith.mulf %2, %3 : vector<1x512xf32>
    %5 = arith.addf %1, %4 : vector<1x512xf32>
    %c0_4 = arith.constant 0 : index
    %c0_5 = arith.constant 0 : index
    %6 = vector.load %arg4[%c0_4, %c0_5] : memref<1x512xf32, #tpu.memory_space<vmem>>, vector<1x512xf32>
    tpu.vector_store %arg4[%c0_4, %c0_5], %5 {strides = array<i32>} : memref<1x512xf32, #tpu.memory_space<vmem>>, vector<1x512xf32>,
    return
  }
  func.func @transform_0(%arg0: i32) -> (i32, i32) {
    %c0_i32 = arith.constant 0 : i32
    %c0_i32_0 = arith.constant 0 : i32
    return %arg0, %c0_i32 : i32, i32
  }
  func.func @transform_1(%arg0: i32) -> (i32, i32) {
    %c0_i32 = arith.constant 0 : i32
    %c0_i32_0 = arith.constant 0 : i32
    return %arg0, %c0_i32 : i32, i32
  }
  func.func @transform_2(%arg0: i32) -> i32 {
    %c0_i32 = arith.constant 0 : i32
    %c0_i32_0 = arith.constant 0 : i32
    return %c0_i32 : i32
  }
  func.func @transform_3(%arg0: i32) -> (i32, i32) {
    %c0_i32 = arith.constant 0 : i32
    %c0_i32_0 = arith.constant 0 : i32
    return %arg0, %c0_i32 : i32, i32
  }
}

</mosaic_0001>

<bundles_post_ra>
// kernel: _rezero_forward.1
= control target key start
LH: loop header
LB: loop body
LE: loop exit
PB: predicated region body
PF: predicated region fallthrough
CT: control target
= control target key end

     0   :  { %v21_v0 = vlaneseq  ;;  %s62_s0 = inlined_call_operand.vmem [shape: f32[1,512], index: 0, kind: input, shape index: {}, may-alias: {0,3}]   ;;  %s63_s1 = inlined_call_operand.vmem [shape: f32[1,512], index: 1, kind: input, shape index: {}]   ;;  %s64_s2 = inlined_call_operand.<no memory space> [shape: f32[1], index: 2, kind: input, shape index: {}]   ;;  %s65_s3 = inlined_call_operand.vmem [shape: f32[1,512], index: 3, kind: output, shape index: {}, may-alias: {0,3}]  }
   0x1   :  { %v16_v1 = vld [vmem:[%s62_s0] sm:$0xf]  ;;  %v18_v3 = vstv %s64_s2 }
   0x2   :  { %v17_v2 = vld [vmem:[%s63_s1] sm:$0xf]  ;;  %vm23_vm0 = vcmp.lt.s32.totalorder %v21_v0, 512 }
   0x3   :  { %v19_v4 = vmul.f32 %v18_v3, %v17_v2 }
   0x5   :  { %v20_v5 = vadd.f32 %v19_v4, %v16_v1 }
   0x7   :  { %25 = vst.msk [vmem:[%s65_s3] sm:$0xf] %vm23_vm0, %v20_v5 }

</bundles_post_ra>
